<compile_context>
chip_gen: v5e
topology: v5e:2x2
jax: 0.10.0
libtpu: 0.0.40
codegen_flags: <defaults>
</compile_context>

<pallas_src>
import functools

import jax
import jax.numpy as jnp
from jax import lax
from jax.experimental import pallas as pl
from jax.experimental.pallas import tpu as pltpu

EPS = 1e-5
NEG_SLOPE = 0.01  # PyTorch LeakyReLU default


def _leaky(x):
    return jnp.where(x >= 0, x, NEG_SLOPE * x)


def _compiler_params():
    # Per-block live set is a few (Cout, T) tiles; 32 MiB leaves ample
    # double-buffering headroom on every generation (incl. v7x's 64 MiB VMEM).
    return pltpu.CompilerParams(
        dimension_semantics=("parallel",),
        vmem_limit_bytes=32 * 1024 * 1024,
    )


# --------------------------- pass 1 ------------------------------------------
def _pass1_kernel(x_ref, wcat_ref, b1_ref, h_ref, *rest, Cout, do_transform):
    """Fused conv1 / residual-transform 1x1 convs + LeakyReLU + BN partial sums."""
    if do_transform:
        r_ref, stat_ref = rest
    else:
        (stat_ref,) = rest
    x = x_ref[0].astype(jnp.bfloat16)                                  # (Cin, T)
    # one MXU push for [conv1 ; transform]  (wcat = [w1 ; wt] stacked on out-ch)
    hp = jnp.dot(wcat_ref[...], x, preferred_element_type=jnp.float32)
    h = _leaky(hp[:Cout] + b1_ref[...])                                # (Cout, T)
    h_ref[0] = h
    stacked = [h, h * h]
    if do_transform:
        r = hp[Cout:]                                                  # (Cout, T)
        r_ref[0] = r
        stacked += [r, r * r]
    # single lane-reduction for all BN partial sums of this block
    stat_ref[0] = jnp.sum(jnp.concatenate(stacked, axis=0), axis=-1, keepdims=True)


# --------------------------- pass 2 ------------------------------------------
def _pass2_kernel(h_ref, bn1_ref, w2_ref, acc_ref, pool_ref, *,
                  K, dilation, pad, T, Cout):
    """BN1 apply + dilated 'same' Conv1d as K accumulated matmuls + SE pool sums."""
    h = h_ref[0] * bn1_ref[:, 0:1] + bn1_ref[:, 1:2]                   # (Cout, T) f32
    if pad > 0:
        z = jnp.zeros((Cout, pad), jnp.float32)
        hpad = jnp.concatenate([z, h, z], axis=-1)                     # (Cout, T+2*pad)
    else:
        hpad = h
    acc = jnp.zeros((Cout, T), jnp.float32)
    # K accumulated MXU matmuls (v7x MRB accumulates in place); the old
    # (N*T, K*Cout) concatenated activation is never materialized.
    for k in range(K):
        tap = hpad[:, k * dilation:k * dilation + T].astype(jnp.bfloat16)
        acc = acc + jnp.dot(w2_ref[k], tap, preferred_element_type=jnp.float32)
    acc_ref[0] = acc
    pool_ref[0] = jnp.sum(acc, axis=-1, keepdims=True)                 # SE time-pool sums


# --------------------------- pass 3 ------------------------------------------
def _pass3_kernel(acc_ref, gate_ref, r_ref, *rest, do_transform):
    """Residual path + SE gating + LeakyReLU + BN3 partial sums."""
    if do_transform:
        bnt_ref, z_ref, stat_ref = rest
        r = r_ref[0] * bnt_ref[:, 0:1] + bnt_ref[:, 1:2]               # BN_t apply
    else:
        z_ref, stat_ref = rest
        r = r_ref[0]
    z = _leaky(r + acc_ref[0] * gate_ref[0])                           # gate bcast over lanes
    z_ref[0] = z
    stat_ref[0] = jnp.sum(jnp.concatenate([z, z * z], axis=0), axis=-1, keepdims=True)


# --------------------------- pass 4 ------------------------------------------
def _pass4_kernel(z_ref, bn3_ref, o_ref):
    """BN3 apply; lane-dense store straight into the (N, Cout, T) output."""
    o_ref[0] = (z_ref[0] * bn3_ref[:, 0:1] + bn3_ref[:, 1:2]).astype(o_ref.dtype)


# --------------------------- glue helpers ------------------------------------
def _bn_scale_shift(s, sq, count, gamma, beta):
    mu = s / count
    var = jnp.maximum(sq / count - mu * mu, 0.0)   # clamp E[x^2]-mu^2 cancellation
    scale = gamma * lax.rsqrt(var + EPS)
    return jnp.stack([scale, beta - mu * scale], axis=-1).astype(jnp.float32)  # (Cout, 2)


@functools.partial(jax.jit, static_argnums=(2, 3))
def res_tdnn_se_pallas(x, params, kernel_size, dilation):
    """x: (N, Cin, T) like PyTorch. Returns (N, Cout, T)."""
    N, Cin, T = x.shape
    conv1_w = params["conv1_w"]                                        # (Cout, Cin, 1)
    Cout = conv1_w.shape[0]
    K = kernel_size
    assert (K - 1) * dilation % 2 == 0, "residual add requires 'same' output length"
    pad = (K - 1) * dilation // 2
    do_transform = Cin != Cout
    x = x.astype(jnp.float32)

    def full(shape):
        return pl.BlockSpec(tuple(shape), lambda n: (0,) * len(shape))

    def per_n(shape):
        return pl.BlockSpec((1,) + tuple(shape[1:]),
                            lambda n: (n,) + (0,) * (len(shape) - 1))

    cp = _compiler_params()

    # ---- weight / parameter prep (tiny, one-time) ----
    w1 = conv1_w[:, :, 0].astype(jnp.bfloat16)                         # (Cout, Cin)
    if do_transform:
        wcat = jnp.concatenate(
            [w1, params["trans_w"][:, :, 0].astype(jnp.bfloat16)], axis=0)  # (2*Cout, Cin)
    else:
        wcat = w1
    b1 = params["conv1_b"].astype(jnp.float32)[:, None]                # (Cout, 1)
    w2 = jnp.transpose(params["conv2_w"], (2, 0, 1)).astype(jnp.bfloat16)  # (K, Cout, Cout)
    nstat1 = 4 if do_transform else 2

    # ---------------- pass 1: fused 1x1 convs + LeakyReLU + BN1/BNt stats ----
    out_shape1 = [jax.ShapeDtypeStruct((N, Cout, T), jnp.float32)]
    out_specs1 = [per_n((N, Cout, T))]
    if do_transform:
        out_shape1.append(jax.ShapeDtypeStruct((N, Cout, T), jnp.float32))
        out_specs1.append(per_n((N, Cout, T)))
    out_shape1.append(jax.ShapeDtypeStruct((N, nstat1 * Cout, 1), jnp.float32))
    out_specs1.append(per_n((N, nstat1 * Cout, 1)))

    res1 = pl.pallas_call(
        functools.partial(_pass1_kernel, Cout=Cout, do_transform=do_transform),
        grid=(N,),
        in_specs=[per_n((N, Cin, T)), full(wcat.shape), full(b1.shape)],
        out_shape=tuple(out_shape1),
        out_specs=tuple(out_specs1),
        compiler_params=cp,
        cost_estimate=pl.CostEstimate(
            flops=2 * N * T * Cin * int(wcat.shape[0]), transcendentals=0,
            bytes_accessed=4 * N * T * (Cin + (nstat1 // 2) * Cout)),
    )(x, wcat, b1)
    if do_transform:
        h_pre, r_pre, stats1 = res1
    else:
        h_pre, stats1 = res1
        r_pre = x                      # identity residual when Cin == Cout

    stats1 = jnp.sum(stats1.reshape(N, nstat1, Cout), axis=0)          # (nstat1, Cout)
    cnt = float(N * T)
    bn1 = _bn_scale_shift(stats1[0], stats1[1], cnt, params["bn1_g"], params["bn1_b"])
    bnt = (_bn_scale_shift(stats1[2], stats1[3], cnt, params["bnt_g"], params["bnt_b"])
           if do_transform else None)

    # ---------------- pass 2: BN1 apply + dilated conv + SE pool sums --------
    acc, pool = pl.pallas_call(
        functools.partial(_pass2_kernel, K=K, dilation=dilation, pad=pad, T=T, Cout=Cout),
        grid=(N,),
        in_specs=[per_n((N, Cout, T)), full((Cout, 2)), full(w2.shape)],
        out_shape=(jax.ShapeDtypeStruct((N, Cout, T), jnp.float32),
                   jax.ShapeDtypeStruct((N, Cout, 1), jnp.float32)),
        out_specs=(per_n((N, Cout, T)), per_n((N, Cout, 1))),
        compiler_params=cp,
        cost_estimate=pl.CostEstimate(
            flops=2 * N * T * K * Cout * Cout, transcendentals=0,
            bytes_accessed=4 * N * T * Cout * 2),
    )(h_pre, bn1, w2)

    # ---- SE gate: (N, Cout) x tiny FCs -> plain JAX (never worth an MXU push) ----
    s = pool[:, :, 0] / T                                              # (N, Cout)
    zf = jnp.maximum(s @ params["se_fc1_w"].T.astype(jnp.float32), 0.0)
    gate = jax.nn.sigmoid(zf @ params["se_fc2_w"].T.astype(jnp.float32))
    gate = gate[:, :, None].astype(jnp.float32)                        # (N, Cout, 1)

    # ---------------- pass 3: residual + gate + LeakyReLU + BN3 stats --------
    in3 = [acc, gate, r_pre]
    in_specs3 = [per_n((N, Cout, T)), per_n((N, Cout, 1)), per_n((N, Cout, T))]
    if do_transform:
        in3.append(bnt)
        in_specs3.append(full((Cout, 2)))
    z_pre, stats3 = pl.pallas_call(
        functools.partial(_pass3_kernel, do_transform=do_transform),
        grid=(N,),
        in_specs=in_specs3,
        out_shape=(jax.ShapeDtypeStruct((N, Cout, T), jnp.float32),
                   jax.ShapeDtypeStruct((N, 2 * Cout, 1), jnp.float32)),
        out_specs=(per_n((N, Cout, T)), per_n((N, 2 * Cout, 1))),
        compiler_params=cp,
        cost_estimate=pl.CostEstimate(
            flops=6 * N * T * Cout, transcendentals=0,
            bytes_accessed=4 * N * T * Cout * 3),
    )(*in3)

    stats3 = jnp.sum(stats3.reshape(N, 2, Cout), axis=0)
    bn3 = _bn_scale_shift(stats3[0], stats3[1], cnt, params["bn3_g"], params["bn3_b"])

    # ---------------- pass 4: BN3 apply, lane-dense (N, Cout, T) store --------
    out = pl.pallas_call(
        _pass4_kernel,
        grid=(N,),
        in_specs=[per_n((N, Cout, T)), full((Cout, 2))],
        out_shape=jax.ShapeDtypeStruct((N, Cout, T), jnp.float32),
        out_specs=per_n((N, Cout, T)),
        compiler_params=cp,
        cost_estimate=pl.CostEstimate(
            flops=2 * N * T * Cout, transcendentals=0,
            bytes_accessed=4 * N * T * Cout * 2),
    )(z_pre, bn3)
    return out


# ------------------- pure-JAX reference (for validation) ---------------------
def _bn_nct(x, gamma, beta):
    mu = jnp.mean(x, axis=(0, 2), keepdims=True)
    var = jnp.mean((x - mu) ** 2, axis=(0, 2), keepdims=True)
    return (x - mu) * lax.rsqrt(var + EPS) * gamma[None, :, None] + beta[None, :, None]


def res_tdnn_se_reference(x, params, kernel_size, dilation):
    pad = (kernel_size - 1) * dilation // 2
    dn = ("NCH", "OIH", "NCH")
    h = lax.conv_general_dilated(x, params["conv1_w"], (1,), [(0, 0)], dimension_numbers=dn)
    h = h + params["conv1_b"][None, :, None]
    h = _leaky(h)
    h = _bn_nct(h, params["bn1_g"], params["bn1_b"])
    y = lax.conv_general_dilated(h, params["conv2_w"], (1,), [(pad, pad)],
                                 rhs_dilation=(dilation,), dimension_numbers=dn)
    s = jnp.mean(y, axis=2)
    z = jnp.maximum(s @ params["se_fc1_w"].T, 0.0)
    g = jax.nn.sigmoid(z @ params["se_fc2_w"].T)
    y = y * g[:, :, None]
    if x.shape[1] != y.shape[1]:
        r = lax.conv_general_dilated(x, params["trans_w"], (1,), [(0, 0)], dimension_numbers=dn)
        r = _bn_nct(r, params["bnt_g"], params["bnt_b"])
    else:
        r = x
    o = _leaky(r + y)
    return _bn_nct(o, params["bn3_g"], params["bn3_b"])


if __name__ == "__main__":
    # small shapes consistent with the module: Conv1d input (N, Cin, T)
    N, Cin, Cout, T = 2, 16, 32, 128
    kernel_size, dilation, reduction = 3, 1, 16
    Cr = Cout // reduction

    ks = jax.random.split(jax.random.PRNGKey(0), 16)
    params = {
        "conv1_w": 0.3 * jax.random.normal(ks[0], (Cout, Cin, 1), jnp.float32),
        "conv1_b": 0.1 * jax.random.normal(ks[1], (Cout,), jnp.float32),
        "bn1_g": 1.0 + 0.1 * jax.random.normal(ks[2], (Cout,), jnp.float32),
        "bn1_b": 0.1 * jax.random.normal(ks[3], (Cout,), jnp.float32),
        "conv2_w": 0.2 * jax.random.normal(ks[4], (Cout, Cout, kernel_size), jnp.float32),
        "se_fc1_w": 0.3 * jax.random.normal(ks[5], (Cr, Cout), jnp.float32),
        "se_fc2_w": 0.3 * jax.random.normal(ks[6], (Cout, Cr), jnp.float32),
        "trans_w": 0.3 * jax.random.normal(ks[7], (Cout, Cin, 1), jnp.float32),
        "bnt_g": 1.0 + 0.1 * jax.random.normal(ks[8], (Cout,), jnp.float32),
        "bnt_b": 0.1 * jax.random.normal(ks[9], (Cout,), jnp.float32),
        "bn3_g": 1.0 + 0.1 * jax.random.normal(ks[10], (Cout,), jnp.float32),
        "bn3_b": 0.1 * jax.random.normal(ks[11], (Cout,), jnp.float32),
    }
    x = jax.random.normal(ks[12], (N, Cin, T), jnp.float32)

    out = jax.block_until_ready(res_tdnn_se_pallas(x, params, kernel_size, dilation))
    ref = jax.block_until_ready(res_tdnn_se_reference(x, params, kernel_size, dilation))

    assert out.shape == (N, Cout, T), out.shape
    max_err = float(jnp.max(jnp.abs(out - ref)))
    # bf16 MXU inputs with f32 accumulation vs f32 reference
    assert max_err < 3e-2, f"mismatch vs reference: max abs err {max_err}"
    print("KERNEL_OK")
</pallas_src>

<mosaic_0001>
module attributes {stable_mosaic.version = 11 : i64} {
  func.func @_pass1_kernel(%arg0: i32, %arg1: memref<1x16x128xf32, #tpu.memory_space<vmem>>, %arg2: memref<64x16xbf16, #tpu.memory_space<vmem>>, %arg3: memref<32x1xf32, #tpu.memory_space<vmem>>, %arg4: memref<1x32x128xf32, #tpu.memory_space<vmem>>, %arg5: memref<1x32x128xf32, #tpu.memory_space<vmem>>, %arg6: memref<1x128x1xf32, #tpu.memory_space<vmem>>) attributes {dimension_semantics = [#tpu.dimension_semantics<parallel>], iteration_bounds = array<i64: 2>, scalar_prefetch = 0 : i64, scratch_operands = 0 : i64, tpu.core_type = #tpu.core_type<tc>, window_params = [{transform_indices = @transform_0, window_bounds = array<i64: 1, 16, 128>}, {pipeline_mode = #tpu.pipeline_mode<synchronous>, transform_indices = @transform_1, window_bounds = array<i64: 64, 16>}, {pipeline_mode = #tpu.pipeline_mode<synchronous>, transform_indices = @transform_2, window_bounds = array<i64: 32, 1>}, {transform_indices = @transform_3, window_bounds = array<i64: 1, 32, 128>}, {transform_indices = @transform_4, window_bounds = array<i64: 1, 32, 128>}, {transform_indices = @transform_5, window_bounds = array<i64: 1, 128, 1>}]} {
    %c0 = arith.constant 0 : index
    %c0_0 = arith.constant 0 : index
    %c0_1 = arith.constant 0 : index
    %0 = vector.load %arg1[%c0, %c0_0, %c0_1] : memref<1x16x128xf32, #tpu.memory_space<vmem>>, vector<1x16x128xf32>
    %1 = vector.shape_cast %0 : vector<1x16x128xf32> to vector<16x128xf32>
    %2 = arith.truncf %1 : vector<16x128xf32> to vector<16x128xbf16>
    %c0_2 = arith.constant 0 : index
    %c0_3 = arith.constant 0 : index
    %3 = vector.load %arg2[%c0_2, %c0_3] : memref<64x16xbf16, #tpu.memory_space<vmem>>, vector<64x16xbf16>
    %cst = arith.constant dense<0.000000e+00> : vector<64x128xf32>
    %4 = tpu.matmul %3, %2, %cst {dimension_numbers = #tpu.dot_dimension_numbers<[1], [0], [0], [1], [0, 0, 1, 1], [], []>} : vector<64x16xbf16>, vector<16x128xbf16>, vector<64x128xf32> -> vector<64x128xf32>
    %5 = vector.extract_strided_slice %4 {offsets = [0, 0], sizes = [32, 128], strides = [1, 1]} : vector<64x128xf32> to vector<32x128xf32>
    %c0_4 = arith.constant 0 : index
    %c0_5 = arith.constant 0 : index
    %6 = vector.load %arg3[%c0_4, %c0_5] : memref<32x1xf32, #tpu.memory_space<vmem>>, vector<32x1xf32>
    %7 = vector.broadcast %6 : vector<32x1xf32> to vector<32x128xf32>
    %8 = arith.addf %5, %7 : vector<32x128xf32>
    %cst_6 = arith.constant 0.000000e+00 : f32
    %9 = vector.broadcast %cst_6 : f32 to vector<32x128xf32>
    %10 = arith.cmpf oge, %8, %9 : vector<32x128xf32>
    %cst_7 = arith.constant 0.00999999977 : f32
    %11 = vector.broadcast %cst_7 : f32 to vector<32x128xf32>
    %12 = arith.mulf %11, %8 : vector<32x128xf32>
    %13 = arith.select %10, %8, %12 : vector<32x128xi1>, vector<32x128xf32>
    %c0_8 = arith.constant 0 : index
    %c0_9 = arith.constant 0 : index
    %c0_10 = arith.constant 0 : index
    %14 = vector.load %arg4[%c0_8, %c0_9, %c0_10] : memref<1x32x128xf32, #tpu.memory_space<vmem>>, vector<1x32x128xf32>
    %15 = vector.shape_cast %14 : vector<1x32x128xf32> to vector<32x128xf32>
    %16 = vector.shape_cast %13 : vector<32x128xf32> to vector<1x32x128xf32>
    tpu.vector_store %arg4[%c0_8, %c0_9, %c0_10], %16 {strides = array<i32>} : memref<1x32x128xf32, #tpu.memory_space<vmem>>, vector<1x32x128xf32>,
    %17 = arith.mulf %13, %13 : vector<32x128xf32>
    %18 = vector.extract_strided_slice %4 {offsets = [32, 0], sizes = [32, 128], strides = [1, 1]} : vector<64x128xf32> to vector<32x128xf32>
    %c0_11 = arith.constant 0 : index
    %c0_12 = arith.constant 0 : index
    %c0_13 = arith.constant 0 : index
    %19 = vector.load %arg5[%c0_11, %c0_12, %c0_13] : memref<1x32x128xf32, #tpu.memory_space<vmem>>, vector<1x32x128xf32>
    %20 = vector.shape_cast %19 : vector<1x32x128xf32> to vector<32x128xf32>
    %21 = vector.shape_cast %18 : vector<32x128xf32> to vector<1x32x128xf32>
    tpu.vector_store %arg5[%c0_11, %c0_12, %c0_13], %21 {strides = array<i32>} : memref<1x32x128xf32, #tpu.memory_space<vmem>>, vector<1x32x128xf32>,
    %22 = arith.mulf %18, %18 : vector<32x128xf32>
    %23 = tpu.concatenate %13, %17, %18, %22 in 0 : vector<32x128xf32>, vector<32x128xf32>, vector<32x128xf32>, vector<32x128xf32> -> vector<128x128xf32>
    %cst_14 = arith.constant dense<0.000000e+00> : vector<128xf32>
    %24 = vector.multi_reduction <add>, %23, %cst_14 [1] : vector<128x128xf32> to vector<128xf32>
    %25 = vector.shape_cast %24 : vector<128xf32> to vector<128x1xf32>
    %c0_15 = arith.constant 0 : index
    %c0_16 = arith.constant 0 : index
    %c0_17 = arith.constant 0 : index
    %26 = vector.load %arg6[%c0_15, %c0_16, %c0_17] : memref<1x128x1xf32, #tpu.memory_space<vmem>>, vector<1x128x1xf32>
    %27 = vector.shape_cast %26 : vector<1x128x1xf32> to vector<128x1xf32>
    %28 = vector.shape_cast %25 : vector<128x1xf32> to vector<1x128x1xf32>
    tpu.vector_store %arg6[%c0_15, %c0_16, %c0_17], %28 {strides = array<i32>} : memref<1x128x1xf32, #tpu.memory_space<vmem>>, vector<1x128x1xf32>,
    return
  }
  func.func @transform_0(%arg0: i32) -> (i32, i32, i32) {
    %c0_i32 = arith.constant 0 : i32
    %c0_i32_0 = arith.constant 0 : i32
    %c0_i32_1 = arith.constant 0 : i32
    return %arg0, %c0_i32, %c0_i32_0 : i32, i32, i32
  }
  func.func @transform_1(%arg0: i32) -> (i32, i32) {
    %c0_i32 = arith.constant 0 : i32
    %c0_i32_0 = arith.constant 0 : i32
    %c0_i32_1 = arith.constant 0 : i32
    return %c0_i32, %c0_i32_0 : i32, i32
  }
  func.func @transform_2(%arg0: i32) -> (i32, i32) {
    %c0_i32 = arith.constant 0 : i32
    %c0_i32_0 = arith.constant 0 : i32
    %c0_i32_1 = arith.constant 0 : i32
    return %c0_i32, %c0_i32_0 : i32, i32
  }
  func.func @transform_3(%arg0: i32) -> (i32, i32, i32) {
    %c0_i32 = arith.constant 0 : i32
    %c0_i32_0 = arith.constant 0 : i32
    %c0_i32_1 = arith.constant 0 : i32
    return %arg0, %c0_i32, %c0_i32_0 : i32, i32, i32
  }
  func.func @transform_4(%arg0: i32) -> (i32, i32, i32) {
    %c0_i32 = arith.constant 0 : i32
    %c0_i32_0 = arith.constant 0 : i32
    %c0_i32_1 = arith.constant 0 : i32
    return %arg0, %c0_i32, %c0_i32_0 : i32, i32, i32
  }
  func.func @transform_5(%arg0: i32) -> (i32, i32, i32) {
    %c0_i32 = arith.constant 0 : i32
    %c0_i32_0 = arith.constant 0 : i32
    %c0_i32_1 = arith.constant 0 : i32
    return %arg0, %c0_i32, %c0_i32_0 : i32, i32, i32
  }
}

module attributes {stable_mosaic.version = 11 : i64} {
  func.func @_pass2_kernel(%arg0: i32, %arg1: memref<1x32x128xf32, #tpu.memory_space<vmem>>, %arg2: memref<32x2xf32, #tpu.memory_space<vmem>>, %arg3: memref<3x32x32xbf16, #tpu.memory_space<vmem>>, %arg4: memref<1x32x128xf32, #tpu.memory_space<vmem>>, %arg5: memref<1x32x1xf32, #tpu.memory_space<vmem>>) attributes {dimension_semantics = [#tpu.dimension_semantics<parallel>], iteration_bounds = array<i64: 2>, scalar_prefetch = 0 : i64, scratch_operands = 0 : i64, tpu.core_type = #tpu.core_type<tc>, window_params = [{transform_indices = @transform_0, window_bounds = array<i64: 1, 32, 128>}, {pipeline_mode = #tpu.pipeline_mode<synchronous>, transform_indices = @transform_1, window_bounds = array<i64: 32, 2>}, {pipeline_mode = #tpu.pipeline_mode<synchronous>, transform_indices = @transform_2, window_bounds = array<i64: 3, 32, 32>}, {transform_indices = @transform_3, window_bounds = array<i64: 1, 32, 128>}, {transform_indices = @transform_4, window_bounds = array<i64: 1, 32, 1>}]} {
    %c0 = arith.constant 0 : index
    %c0_0 = arith.constant 0 : index
    %c0_1 = arith.constant 0 : index
    %0 = vector.load %arg1[%c0, %c0_0, %c0_1] : memref<1x32x128xf32, #tpu.memory_space<vmem>>, vector<1x32x128xf32>
    %1 = vector.shape_cast %0 : vector<1x32x128xf32> to vector<32x128xf32>
    %c0_2 = arith.constant 0 : index
    %c0_3 = arith.constant 0 : index
    %2 = vector.load %arg2[%c0_2, %c0_3] : memref<32x2xf32, #tpu.memory_space<vmem>>, vector<32x1xf32>
    %3 = vector.broadcast %2 : vector<32x1xf32> to vector<32x128xf32>
    %4 = arith.mulf %1, %3 : vector<32x128xf32>
    %c0_4 = arith.constant 0 : index
    %c1 = arith.constant 1 : index
    %5 = vector.load %arg2[%c0_4, %c1] : memref<32x2xf32, #tpu.memory_space<vmem>>, vector<32x1xf32>
    %6 = vector.broadcast %5 : vector<32x1xf32> to vector<32x128xf32>
    %7 = arith.addf %4, %6 : vector<32x128xf32>
    %cst = arith.constant 0.000000e+00 : f32
    %8 = vector.broadcast %cst : f32 to vector<32x1xf32>
    %9 = tpu.concatenate %8, %7, %8 in 1 : vector<32x1xf32>, vector<32x128xf32>, vector<32x1xf32> -> vector<32x130xf32>
    %cst_5 = arith.constant 0.000000e+00 : f32
    %10 = vector.broadcast %cst_5 : f32 to vector<32x128xf32>
    %11 = vector.extract_strided_slice %9 {offsets = [0, 0], sizes = [32, 128], strides = [1, 1]} : vector<32x130xf32> to vector<32x128xf32>
    %12 = arith.truncf %11 : vector<32x128xf32> to vector<32x128xbf16>
    %c0_6 = arith.constant 0 : index
    %c0_7 = arith.constant 0 : index
    %c0_8 = arith.constant 0 : index
    %13 = vector.load %arg3[%c0_6, %c0_7, %c0_8] : memref<3x32x32xbf16, #tpu.memory_space<vmem>>, vector<1x32x32xbf16>
    %14 = vector.shape_cast %13 : vector<1x32x32xbf16> to vector<32x32xbf16>
    %cst_9 = arith.constant dense<0.000000e+00> : vector<32x128xf32>
    %15 = tpu.matmul %14, %12, %cst_9 {dimension_numbers = #tpu.dot_dimension_numbers<[1], [0], [0], [1], [0, 0, 1, 1], [], []>} : vector<32x32xbf16>, vector<32x128xbf16>, vector<32x128xf32> -> vector<32x128xf32>
    %16 = arith.addf %10, %15 : vector<32x128xf32>
    %17 = vector.extract_strided_slice %9 {offsets = [0, 1], sizes = [32, 128], strides = [1, 1]} : vector<32x130xf32> to vector<32x128xf32>
    %18 = arith.truncf %17 : vector<32x128xf32> to vector<32x128xbf16>
    %c1_10 = arith.constant 1 : index
    %c0_11 = arith.constant 0 : index
    %c0_12 = arith.constant 0 : index
    %19 = vector.load %arg3[%c1_10, %c0_11, %c0_12] : memref<3x32x32xbf16, #tpu.memory_space<vmem>>, vector<1x32x32xbf16>
    %20 = vector.shape_cast %19 : vector<1x32x32xbf16> to vector<32x32xbf16>
    %cst_13 = arith.constant dense<0.000000e+00> : vector<32x128xf32>
    %21 = tpu.matmul %20, %18, %cst_13 {dimension_numbers = #tpu.dot_dimension_numbers<[1], [0], [0], [1], [0, 0, 1, 1], [], []>} : vector<32x32xbf16>, vector<32x128xbf16>, vector<32x128xf32> -> vector<32x128xf32>
    %22 = arith.addf %16, %21 : vector<32x128xf32>
    %23 = vector.extract_strided_slice %9 {offsets = [0, 2], sizes = [32, 128], strides = [1, 1]} : vector<32x130xf32> to vector<32x128xf32>
    %24 = arith.truncf %23 : vector<32x128xf32> to vector<32x128xbf16>
    %c2 = arith.constant 2 : index
    %c0_14 = arith.constant 0 : index
    %c0_15 = arith.constant 0 : index
    %25 = vector.load %arg3[%c2, %c0_14, %c0_15] : memref<3x32x32xbf16, #tpu.memory_space<vmem>>, vector<1x32x32xbf16>
    %26 = vector.shape_cast %25 : vector<1x32x32xbf16> to vector<32x32xbf16>
    %cst_16 = arith.constant dense<0.000000e+00> : vector<32x128xf32>
    %27 = tpu.matmul %26, %24, %cst_16 {dimension_numbers = #tpu.dot_dimension_numbers<[1], [0], [0], [1], [0, 0, 1, 1], [], []>} : vector<32x32xbf16>, vector<32x128xbf16>, vector<32x128xf32> -> vector<32x128xf32>
    %28 = arith.addf %22, %27 : vector<32x128xf32>
    %c0_17 = arith.constant 0 : index
    %c0_18 = arith.constant 0 : index
    %c0_19 = arith.constant 0 : index
    %29 = vector.load %arg4[%c0_17, %c0_18, %c0_19] : memref<1x32x128xf32, #tpu.memory_space<vmem>>, vector<1x32x128xf32>
    %30 = vector.shape_cast %29 : vector<1x32x128xf32> to vector<32x128xf32>
    %31 = vector.shape_cast %28 : vector<32x128xf32> to vector<1x32x128xf32>
    tpu.vector_store %arg4[%c0_17, %c0_18, %c0_19], %31 {strides = array<i32>} : memref<1x32x128xf32, #tpu.memory_space<vmem>>, vector<1x32x128xf32>,
    %cst_20 = arith.constant dense<0.000000e+00> : vector<32xf32>
    %32 = vector.multi_reduction <add>, %28, %cst_20 [1] : vector<32x128xf32> to vector<32xf32>
    %33 = vector.shape_cast %32 : vector<32xf32> to vector<32x1xf32>
    %c0_21 = arith.constant 0 : index
    %c0_22 = arith.constant 0 : index
    %c0_23 = arith.constant 0 : index
    %34 = vector.load %arg5[%c0_21, %c0_22, %c0_23] : memref<1x32x1xf32, #tpu.memory_space<vmem>>, vector<1x32x1xf32>
    %35 = vector.shape_cast %34 : vector<1x32x1xf32> to vector<32x1xf32>
    %36 = vector.shape_cast %33 : vector<32x1xf32> to vector<1x32x1xf32>
    tpu.vector_store %arg5[%c0_21, %c0_22, %c0_23], %36 {strides = array<i32>} : memref<1x32x1xf32, #tpu.memory_space<vmem>>, vector<1x32x1xf32>,
    return
  }
  func.func @transform_0(%arg0: i32) -> (i32, i32, i32) {
    %c0_i32 = arith.constant 0 : i32
    %c0_i32_0 = arith.constant 0 : i32
    %c0_i32_1 = arith.constant 0 : i32
    return %arg0, %c0_i32, %c0_i32_0 : i32, i32, i32
  }
  func.func @transform_1(%arg0: i32) -> (i32, i32) {
    %c0_i32 = arith.constant 0 : i32
    %c0_i32_0 = arith.constant 0 : i32
    %c0_i32_1 = arith.constant 0 : i32
    return %c0_i32, %c0_i32_0 : i32, i32
  }
  func.func @transform_2(%arg0: i32) -> (i32, i32, i32) {
    %c0_i32 = arith.constant 0 : i32
    %c0_i32_0 = arith.constant 0 : i32
    %c0_i32_1 = arith.constant 0 : i32
    %c0_i32_2 = arith.constant 0 : i32
    return %c0_i32, %c0_i32_0, %c0_i32_1 : i32, i32, i32
  }
  func.func @transform_3(%arg0: i32) -> (i32, i32, i32) {
    %c0_i32 = arith.constant 0 : i32
    %c0_i32_0 = arith.constant 0 : i32
    %c0_i32_1 = arith.constant 0 : i32
    return %arg0, %c0_i32, %c0_i32_0 : i32, i32, i32
  }
  func.func @transform_4(%arg0: i32) -> (i32, i32, i32) {
    %c0_i32 = arith.constant 0 : i32
    %c0_i32_0 = arith.constant 0 : i32
    %c0_i32_1 = arith.constant 0 : i32
    return %arg0, %c0_i32, %c0_i32_0 : i32, i32, i32
  }
}

module attributes {stable_mosaic.version = 11 : i64} {
  func.func @_pass3_kernel(%arg0: i32, %arg1: memref<1x32x128xf32, #tpu.memory_space<vmem>>, %arg2: memref<1x32x1xf32, #tpu.memory_space<vmem>>, %arg3: memref<1x32x128xf32, #tpu.memory_space<vmem>>, %arg4: memref<32x2xf32, #tpu.memory_space<vmem>>, %arg5: memref<1x32x128xf32, #tpu.memory_space<vmem>>, %arg6: memref<1x64x1xf32, #tpu.memory_space<vmem>>) attributes {dimension_semantics = [#tpu.dimension_semantics<parallel>], iteration_bounds = array<i64: 2>, scalar_prefetch = 0 : i64, scratch_operands = 0 : i64, tpu.core_type = #tpu.core_type<tc>, window_params = [{transform_indices = @transform_0, window_bounds = array<i64: 1, 32, 128>}, {transform_indices = @transform_1, window_bounds = array<i64: 1, 32, 1>}, {transform_indices = @transform_2, window_bounds = array<i64: 1, 32, 128>}, {pipeline_mode = #tpu.pipeline_mode<synchronous>, transform_indices = @transform_3, window_bounds = array<i64: 32, 2>}, {transform_indices = @transform_4, window_bounds = array<i64: 1, 32, 128>}, {transform_indices = @transform_5, window_bounds = array<i64: 1, 64, 1>}]} {
    %c0 = arith.constant 0 : index
    %c0_0 = arith.constant 0 : index
    %c0_1 = arith.constant 0 : index
    %0 = vector.load %arg3[%c0, %c0_0, %c0_1] : memref<1x32x128xf32, #tpu.memory_space<vmem>>, vector<1x32x128xf32>
    %1 = vector.shape_cast %0 : vector<1x32x128xf32> to vector<32x128xf32>
    %c0_2 = arith.constant 0 : index
    %c0_3 = arith.constant 0 : index
    %2 = vector.load %arg4[%c0_2, %c0_3] : memref<32x2xf32, #tpu.memory_space<vmem>>, vector<32x1xf32>
    %3 = vector.broadcast %2 : vector<32x1xf32> to vector<32x128xf32>
    %4 = arith.mulf %1, %3 : vector<32x128xf32>
    %c0_4 = arith.constant 0 : index
    %c1 = arith.constant 1 : index
    %5 = vector.load %arg4[%c0_4, %c1] : memref<32x2xf32, #tpu.memory_space<vmem>>, vector<32x1xf32>
    %6 = vector.broadcast %5 : vector<32x1xf32> to vector<32x128xf32>
    %7 = arith.addf %4, %6 : vector<32x128xf32>
    %c0_5 = arith.constant 0 : index
    %c0_6 = arith.constant 0 : index
    %c0_7 = arith.constant 0 : index
    %8 = vector.load %arg1[%c0_5, %c0_6, %c0_7] : memref<1x32x128xf32, #tpu.memory_space<vmem>>, vector<1x32x128xf32>
    %9 = vector.shape_cast %8 : vector<1x32x128xf32> to vector<32x128xf32>
    %c0_8 = arith.constant 0 : index
    %c0_9 = arith.constant 0 : index
    %c0_10 = arith.constant 0 : index
    %10 = vector.load %arg2[%c0_8, %c0_9, %c0_10] : memref<1x32x1xf32, #tpu.memory_space<vmem>>, vector<1x32x1xf32>
    %11 = vector.shape_cast %10 : vector<1x32x1xf32> to vector<32x1xf32>
    %12 = vector.broadcast %11 : vector<32x1xf32> to vector<32x128xf32>
    %13 = arith.mulf %9, %12 : vector<32x128xf32>
    %14 = arith.addf %7, %13 : vector<32x128xf32>
    %cst = arith.constant 0.000000e+00 : f32
    %15 = vector.broadcast %cst : f32 to vector<32x128xf32>
    %16 = arith.cmpf oge, %14, %15 : vector<32x128xf32>
    %cst_11 = arith.constant 0.00999999977 : f32
    %17 = vector.broadcast %cst_11 : f32 to vector<32x128xf32>
    %18 = arith.mulf %17, %14 : vector<32x128xf32>
    %19 = arith.select %16, %14, %18 : vector<32x128xi1>, vector<32x128xf32>
    %c0_12 = arith.constant 0 : index
    %c0_13 = arith.constant 0 : index
    %c0_14 = arith.constant 0 : index
    %20 = vector.load %arg5[%c0_12, %c0_13, %c0_14] : memref<1x32x128xf32, #tpu.memory_space<vmem>>, vector<1x32x128xf32>
    %21 = vector.shape_cast %20 : vector<1x32x128xf32> to vector<32x128xf32>
    %22 = vector.shape_cast %19 : vector<32x128xf32> to vector<1x32x128xf32>
    tpu.vector_store %arg5[%c0_12, %c0_13, %c0_14], %22 {strides = array<i32>} : memref<1x32x128xf32, #tpu.memory_space<vmem>>, vector<1x32x128xf32>,
    %23 = arith.mulf %19, %19 : vector<32x128xf32>
    %24 = tpu.concatenate %19, %23 in 0 : vector<32x128xf32>, vector<32x128xf32> -> vector<64x128xf32>
    %cst_15 = arith.constant dense<0.000000e+00> : vector<64xf32>
    %25 = vector.multi_reduction <add>, %24, %cst_15 [1] : vector<64x128xf32> to vector<64xf32>
    %26 = vector.shape_cast %25 : vector<64xf32> to vector<64x1xf32>
    %c0_16 = arith.constant 0 : index
    %c0_17 = arith.constant 0 : index
    %c0_18 = arith.constant 0 : index
    %27 = vector.load %arg6[%c0_16, %c0_17, %c0_18] : memref<1x64x1xf32, #tpu.memory_space<vmem>>, vector<1x64x1xf32>
    %28 = vector.shape_cast %27 : vector<1x64x1xf32> to vector<64x1xf32>
    %29 = vector.shape_cast %26 : vector<64x1xf32> to vector<1x64x1xf32>
    tpu.vector_store %arg6[%c0_16, %c0_17, %c0_18], %29 {strides = array<i32>} : memref<1x64x1xf32, #tpu.memory_space<vmem>>, vector<1x64x1xf32>,
    return
  }
  func.func @transform_0(%arg0: i32) -> (i32, i32, i32) {
    %c0_i32 = arith.constant 0 : i32
    %c0_i32_0 = arith.constant 0 : i32
    %c0_i32_1 = arith.constant 0 : i32
    return %arg0, %c0_i32, %c0_i32_0 : i32, i32, i32
  }
  func.func @transform_1(%arg0: i32) -> (i32, i32, i32) {
    %c0_i32 = arith.constant 0 : i32
    %c0_i32_0 = arith.constant 0 : i32
    %c0_i32_1 = arith.constant 0 : i32
    return %arg0, %c0_i32, %c0_i32_0 : i32, i32, i32
  }
  func.func @transform_2(%arg0: i32) -> (i32, i32, i32) {
    %c0_i32 = arith.constant 0 : i32
    %c0_i32_0 = arith.constant 0 : i32
    %c0_i32_1 = arith.constant 0 : i32
    return %arg0, %c0_i32, %c0_i32_0 : i32, i32, i32
  }
  func.func @transform_3(%arg0: i32) -> (i32, i32) {
    %c0_i32 = arith.constant 0 : i32
    %c0_i32_0 = arith.constant 0 : i32
    %c0_i32_1 = arith.constant 0 : i32
    return %c0_i32, %c0_i32_0 : i32, i32
  }
  func.func @transform_4(%arg0: i32) -> (i32, i32, i32) {
    %c0_i32 = arith.constant 0 : i32
    %c0_i32_0 = arith.constant 0 : i32
    %c0_i32_1 = arith.constant 0 : i32
    return %arg0, %c0_i32, %c0_i32_0 : i32, i32, i32
  }
  func.func @transform_5(%arg0: i32) -> (i32, i32, i32) {
    %c0_i32 = arith.constant 0 : i32
    %c0_i32_0 = arith.constant 0 : i32
    %c0_i32_1 = arith.constant 0 : i32
    return %arg0, %c0_i32, %c0_i32_0 : i32, i32, i32
  }
}

module attributes {stable_mosaic.version = 11 : i64} {
  func.func @_pass4_kernel(%arg0: i32, %arg1: memref<1x32x128xf32, #tpu.memory_space<vmem>>, %arg2: memref<32x2xf32, #tpu.memory_space<vmem>>, %arg3: memref<1x32x128xf32, #tpu.memory_space<vmem>>) attributes {dimension_semantics = [#tpu.dimension_semantics<parallel>], iteration_bounds = array<i64: 2>, scalar_prefetch = 0 : i64, scratch_operands = 0 : i64, tpu.core_type = #tpu.core_type<tc>, window_params = [{transform_indices = @transform_0, window_bounds = array<i64: 1, 32, 128>}, {pipeline_mode = #tpu.pipeline_mode<synchronous>, transform_indices = @transform_1, window_bounds = array<i64: 32, 2>}, {transform_indices = @transform_2, window_bounds = array<i64: 1, 32, 128>}]} {
    %c0 = arith.constant 0 : index
    %c0_0 = arith.constant 0 : index
    %c0_1 = arith.constant 0 : index
    %0 = vector.load %arg1[%c0, %c0_0, %c0_1] : memref<1x32x128xf32, #tpu.memory_space<vmem>>, vector<1x32x128xf32>
    %1 = vector.shape_cast %0 : vector<1x32x128xf32> to vector<32x128xf32>
    %c0_2 = arith.constant 0 : index
    %c0_3 = arith.constant 0 : index
    %2 = vector.load %arg2[%c0_2, %c0_3] : memref<32x2xf32, #tpu.memory_space<vmem>>, vector<32x1xf32>
    %3 = vector.broadcast %2 : vector<32x1xf32> to vector<32x128xf32>
    %4 = arith.mulf %1, %3 : vector<32x128xf32>
    %c0_4 = arith.constant 0 : index
    %c1 = arith.constant 1 : index
    %5 = vector.load %arg2[%c0_4, %c1] : memref<32x2xf32, #tpu.memory_space<vmem>>, vector<32x1xf32>
    %6 = vector.broadcast %5 : vector<32x1xf32> to vector<32x128xf32>
    %7 = arith.addf %4, %6 : vector<32x128xf32>
    %c0_5 = arith.constant 0 : index
    %c0_6 = arith.constant 0 : index
    %c0_7 = arith.constant 0 : index
    %8 = vector.load %arg3[%c0_5, %c0_6, %c0_7] : memref<1x32x128xf32, #tpu.memory_space<vmem>>, vector<1x32x128xf32>
    %9 = vector.shape_cast %8 : vector<1x32x128xf32> to vector<32x128xf32>
    %10 = vector.shape_cast %7 : vector<32x128xf32> to vector<1x32x128xf32>
    tpu.vector_store %arg3[%c0_5, %c0_6, %c0_7], %10 {strides = array<i32>} : memref<1x32x128xf32, #tpu.memory_space<vmem>>, vector<1x32x128xf32>,
    return
  }
  func.func @transform_0(%arg0: i32) -> (i32, i32, i32) {
    %c0_i32 = arith.constant 0 : i32
    %c0_i32_0 = arith.constant 0 : i32
    %c0_i32_1 = arith.constant 0 : i32
    return %arg0, %c0_i32, %c0_i32_0 : i32, i32, i32
  }
  func.func @transform_1(%arg0: i32) -> (i32, i32) {
    %c0_i32 = arith.constant 0 : i32
    %c0_i32_0 = arith.constant 0 : i32
    %c0_i32_1 = arith.constant 0 : i32
    return %c0_i32, %c0_i32_0 : i32, i32
  }
  func.func @transform_2(%arg0: i32) -> (i32, i32, i32) {
    %c0_i32 = arith.constant 0 : i32
    %c0_i32_0 = arith.constant 0 : i32
    %c0_i32_1 = arith.constant 0 : i32
    return %arg0, %c0_i32, %c0_i32_0 : i32, i32, i32
  }
}

</mosaic_0001>

<bundles_post_ra>
// kernel: res_tdnn_se_pallas.5
= control target key start
LH: loop header
LB: loop body
LE: loop exit
PB: predicated region body
PF: predicated region fallthrough
CT: control target
= control target key end

     0   :  { %s688_s15 = smov 0   ;;  %s779_s0 = inlined_call_operand.vmem [shape: f32[2,32,128], index: 0, kind: input, shape index: {}]   ;;  %s780_s1 = inlined_call_operand.vmem [shape: f32[32,2], index: 1, kind: input, shape index: {}]   ;;  %s781_s2 = inlined_call_operand.vmem [shape: bf16[3,32,32], index: 2, kind: input, shape index: {}]   ;;  %s782_s3 = inlined_call_operand.vmem [shape: f32[2,32,128], index: 3, kind: output, shape index: {0}]   ;;  %s783_s4 = inlined_call_operand.vmem [shape: f32[2,32,1], index: 4, kind: output, shape index: {1}]  }
   0x1 LB: > { %s551_s16 = sadd.s32 4294967295, %s656_s15   ;;  %p555_p0 = scmp.ge.s32.totalorder %s656_s15, 1  ;;  %s656_s15 = sphi %s688_s15, %s15_s15  }
   0x2   : > { %p165_p1 = scmp.lt.s32.totalorder %s656_s15, 3 }
   0x4   : > { %p166_p2 = pnand %p555_p0, %p165_p1 }
   0x5   : > { %p196_p3 = scmp.lt.s32.totalorder (!%p166_p2), %s551_s16, 1  ;;  %s660_s29 = smov (!%p166_p2), 1  }
   0x6   : > { %169 = sbr.rel (%p166_p2) target bundleno = 664 (0x298), region = 32  ;;  %s661_s30 = smov (!%p166_p2), 126  }
   0x7   : > { %s662_s5 = smov (!%p166_p2), 127  }
   0xb   : > { %v218_v0 = vld [vmem:[%s780_s1 + $0x10] sm:$0xff]  ;;  %v658_v1 = vmov 1   ;;  %v659_v2 = vmov 0   ;;  %v216_v3 = vld [vmem:[%s780_s1] sm:$0xff]  ;;  %v219_v4 = vld [vmem:[%s780_s1 + $0x18] sm:$0xff]  ;;  %s787_s16 = smov (!%p196_p3, %s551_s16), 1 }
   0xc   : > { %637 = vset.pattern.permute.xlu1 %v658_v1  ;;  %636 = vset.pattern.permute.xlu0 %v659_v2  ;;  %v217_v5 = vld [vmem:[%s780_s1 + $0x8] sm:$0xff]  ;;  %s708_s25 = sshll.u32 %s787_s16, 5  ;;  %vm280_vm0 = vcmask 7168   ;;  %vm413_vm3 = vcmask 1031168   ;;  %v615_v49 = vld [vmem:[%s781_s2] sm:$0xff]  ;;  %vm329_vm4 = vcmask 261120  }
   0xd   : > { %253 = vperm.xlu1 %637, %v218_v0   ;;  %232 = vperm.xlu0 %636, %v218_v0   ;;  %s200_s28 = scalar_lea.vmem %s779_s0, %s708_s25  ;;  %vm715_vm1 = vmneg %vm280_vm0  ;;  %v616_v53 = vld [vmem:[%s781_s2 + $0x8] sm:$0xff]  ;;  %v619_v57 = vld [vmem:[%s781_s2 + $0x20] sm:$0xff]  ;;  %vm324_vm5 = vcmask 1039360   ;;  %s205_s21 = scalar_lea.vmem %s782_s3, %s708_s25 }
   0xe   : > { %638 = vset.pattern.permute.xlu2 %v659_v2  ;;  %v214_v9 = vld [vmem:[%s200_s28 + $0x10] sm:$0xff]  ;;  %v215_v10 = vld [vmem:[%s200_s28 + $0x18] sm:$0xff]  ;;  %v213_v18 = vld [vmem:[%s200_s28 + $0x8] sm:$0xff]  ;;  %s210_s24 = scalar_lea.vmem %s783_s4, %s708_s25 }
   0xf   : > { %222 = vperm.xlu2 %638, %v216_v3   ;;  %v212_v19 = vld [vmem:[%s200_s28] sm:$0xff]  ;;  %vm586_vm2 = vmpackc.low %vm715_vm1, %vm715_vm1  ;;  %v617_v0 = vld [vmem:[%s781_s2 + $0x10] sm:$0xff] }
  0x10   : > { %v620_v2 = vld [vmem:[%s781_s2 + $0x28] sm:$0xff] }
  0x15   : > { %257 = vperm.xlu1 %637, %v219_v4   ;;  %237 = vperm.xlu0 %636, %v219_v4  }
  0x17   : > { %227 = vperm.xlu2 %638, %v217_v5  }
  0x1d   : > { %639 = vset.pattern.permute.xlu0 %v658_v1  ;;  %249 = vperm.xlu1 %637, %v217_v5   ;;  %v618_v1 = vld [vmem:[%s781_s2 + $0x18] sm:$0xff] }
  0x1e   : > { %245 = vperm.xlu0 %639, %v216_v3  }
  0x69   : > { %v223_v8 = vpop.permute.xlu2 %222 }
  0x6a   : > { %v240_v22 = vmul.f32 %v223_v8, %v212_v19 }
  0x71   : > { %v228_v17 = vpop.permute.xlu2 %227 }
  0x72   : > { %v241_v21 = vmul.f32 %v228_v17, %v213_v18 }
  0x7f   : > { %v254_v6 = vpop.permute.xlu1 %253  ;;  %v233_v7 = vpop.permute.xlu0 %232 }
  0x80   : > { %v242_v11 = vmul.f32 %v233_v7, %v214_v9 }
  0x82   : > { %v262_v15 = vadd.f32 %v254_v6, %v242_v11 }
  0x87   : > { %v258_v12 = vpop.permute.xlu1 %257  ;;  %v238_v13 = vpop.permute.xlu0 %237 }
  0x88   : > { %v243_v14 = vmul.f32 %v238_v13, %v215_v10 }
  0x8a   : > { %v263_v16 = vadd.f32 %v258_v12, %v243_v14 }
  0x8c   : > { %v640_v20 = vpack.i.bf16 %v263_v16, %v262_v15 }
  0x8e   : > { %641 = vrot.lane.b32.xlu2 %v640_v20, %s660_s29 }
  0x8f   : > { %v250_v23 = vpop.permute.xlu1 %249 }
  0x90   : > { %v261_v24 = vadd.f32 %v250_v23, %v241_v21  ;;  %v246_v25 = vpop.permute.xlu0 %245 }
  0x91   : > { %v260_v26 = vadd.f32 %v246_v25, %v240_v22 }
  0x93   : > { %v645_v27 = vpack.i.bf16 %v261_v24, %v260_v26 }
  0x95   : > { %646 = vrot.lane.b32.xlu1 %v645_v27, %s660_s29 }
  0xe8   : > { %v642_v29 = vpop.permute.xlu2 %641 }
  0xe9   : > { %v644_v30 = vunpack.i.h.bf16 %v642_v29  ;;  %v643_v31 = vunpack.i.l.bf16 %v642_v29 }
  0xeb   : > { %v587_v32 = vpack.c.bf16 %v644_v30, %v643_v31  ;;  %v287_v33 = vsel %vm280_vm0, %v643_v31, 0.0  ;;  %v288_v34 = vsel %vm280_vm0, %v644_v30, 0.0  ;;  %v283_v35 = vsel %vm280_vm0, 0.0, %v643_v31 }
  0xec   : > { %v296_v36 = vpack.c.bf16 %v288_v34, %v287_v33  ;;  %v284_v37 = vsel %vm280_vm0, 0.0, %v644_v30 }
  0xed   : > { %588 = vmatpush.bf16.msk.msra.mxu1 %vm586_vm2, %v587_v32  ;;  %v290_v38 = vpack.c.bf16 %v284_v37, %v283_v35 }
  0xee   : > { %411 = vrot.lane.b32.xlu0 %v296_v36, %s661_s30 }
  0xef   : > { %409 = vrot.lane.b32.xlu2 %v290_v38, %s661_s30 }
  0xf6   : > { %320 = vrot.lane.b32.xlu0 %v290_v38, %s662_s5 }
 0x107   : > { %v647_v39 = vpop.permute.xlu1 %646 }
 0x108   : > { %v649_v40 = vunpack.i.h.bf16 %v647_v39  ;;  %v648_v41 = vunpack.i.l.bf16 %v647_v39 }
 0x10a   : > { %v592_v42 = vpack.c.bf16 %v649_v40, %v648_v41  ;;  %v285_v43 = vsel %vm280_vm0, %v648_v41, 0.0  ;;  %v286_v44 = vsel %vm280_vm0, %v649_v40, 0.0  ;;  %v281_v45 = vsel %vm280_vm0, 0.0, %v648_v41 }
 0x10b   : > { %v295_v46 = vpack.c.bf16 %v286_v44, %v285_v43  ;;  %v282_v47 = vsel %vm280_vm0, 0.0, %v649_v40 }
 0x10c   : > { %593 = vmatpush.bf16.msk.msra.mxu1 %vm586_vm2, %v592_v42  ;;  %v289_v48 = vpack.c.bf16 %v282_v47, %v281_v45 }
 0x10d   : > { %318 = vrot.lane.b32.xlu0 %v295_v46, %s662_s5  ;;  %407 = vrot.lane.b32.xlu2 %v295_v46, %s661_s30 }
 0x10e   : > { %405 = vrot.lane.b32.xlu1 %v289_v48, %s661_s30 }
 0x10f   : > { %594 = vmatmul.msk.bf16.vlgmr.msra.gmra.mxu1 %vm329_vm4, %v615_v49 }
 0x115   : > { %316 = vrot.lane.b32.xlu2 %v289_v48, %s662_s5 }
 0x116   : > { %322 = vrot.lane.b32.xlu1 %v296_v36, %s662_s5 }
 0x11f   : > { %595 = vmatmul.msk.bf16.gmra.mxu1 %vm329_vm4, %v616_v53 }
 0x149   : > { %v410_v50 = vpop.permute.xlu2 %409 }
 0x160   : > { %v412_v51 = vpop.permute.xlu0 %411 }
 0x161   : > { %v415_v52 = vsel %vm413_vm3, %v410_v50, %v412_v51 }
 0x162   : > { %430 = vmatpush.bf16.msra.mxu2 %v415_v52 }
 0x167   : > { %v408_v54 = vpop.permute.xlu2 %407 }
 0x168   : > { %v321_v58 = vpop.permute.xlu0 %320 }
 0x16f   : > { %v317_v62 = vpop.permute.xlu2 %316 }
 0x17f   : > { %v319_v61 = vpop.permute.xlu0 %318 }
 0x180   : > { %v406_v55 = vpop.permute.xlu1 %405  ;;  %v325_v63 = vsel %vm324_vm5, %v317_v62, %v319_v61 }
 0x181   : > { %v414_v56 = vsel %vm413_vm3, %v406_v55, %v408_v54 }
 0x182   : > { %431 = vmatpush.bf16.msra.mxu2 %v414_v56 }
 0x185   : > { %608 = vmatmul.msk.bf16.vlgmr.msra.gmra.mxu2 %vm329_vm4, %v619_v57 }
 0x188   : > { %v323_v59 = vpop.permute.xlu1 %322 }
 0x189   : > { %v326_v60 = vsel %vm324_vm5, %v321_v58, %v323_v59 }
 0x18a   : > { %342 = vmatpush.bf16.msra.mxu0 %v326_v60  ;;  %621 = vmatpush.bf16.msra.mxu3 %v326_v60 }
 0x18c   : > { %v380_v3 = vpop.f32.mrf.mxu1 }
 0x18e   : > { %343 = vmatpush.bf16.msra.mxu0 %v325_v63  ;;  %622 = vmatpush.bf16.msra.mxu3 %v325_v63 }
 0x191   : > { %574 = vmatmul.msk.bf16.vlgmr.msra.gmra.mxu0 %vm329_vm4, %v617_v0  ;;  %575 = vmatmul.msk.bf16.vlgmr.msra.gmra.mxu3 %vm329_vm4, %v618_v1 }
 0x194   : > { %v382_v5 = vpop.f32.mrf.mxu1 }
 0x195   : > { %609 = vmatmul.msk.bf16.gmra.mxu2 %vm329_vm4, %v620_v2 }
 0x19c   : > { %v385_v10 = vpop.f32.mrf.mxu1 }
 0x1a4   : > { %v387_v19 = vpop.f32.mrf.mxu1 }
 0x208   : > { %v433_v4 = vpop.f32.mrf.mxu2 }
 0x20e   : > { %v345_v6 = vpop.f32.mrf.mxu0 }
 0x20f   : > { %v381_v7 = vadd.f32 %v380_v3, %v345_v6 }
 0x210   : > { %v435_v8 = vpop.f32.mrf.mxu2 }
 0x211   : > { %v443_v9 = vadd.f32 %v433_v4, %v381_v7 }
 0x213   : > { %451 = vadd.xlane.f32.xlu1 %v443_v9  ;;  %447 = vst [vmem:[%s205_s21] sm:$0xff] %v443_v9 }
 0x214   : > { %v350_v11 = vpop.f32.mrf.mxu3 }
 0x215   : > { %v386_v12 = vadd.f32 %v385_v10, %v350_v11 }
 0x216   : > { %v347_v13 = vpop.f32.mrf.mxu0 }
 0x217   : > { %v383_v14 = vadd.f32 %v382_v5, %v347_v13 }
 0x218   : > { %v438_v15 = vpop.f32.mrf.mxu2 }
 0x219   : > { %v445_v16 = vadd.f32 %v438_v15, %v386_v12  ;;  %v444_v17 = vadd.f32 %v435_v8, %v383_v14 }
 0x21b   : > { %449 = vst [vmem:[%s205_s21 + $0x10] sm:$0xff] %v445_v16  ;;  %455 = vadd.xlane.f32.xlu0 %v445_v16  ;;  %453 = vadd.xlane.f32.xlu2 %v444_v17 }
 0x21c   : > { %448 = vst [vmem:[%s205_s21 + $0x8] sm:$0xff] %v444_v17  ;;  %v352_v18 = vpop.f32.mrf.mxu3 }
 0x21d   : > { %v388_v20 = vadd.f32 %v387_v19, %v352_v18 }
 0x220   : > { %v440_v21 = vpop.f32.mrf.mxu2 }
 0x221   : > { %v446_v22 = vadd.f32 %v440_v21, %v388_v20 }
 0x223   : > { %450 = vst [vmem:[%s205_s21 + $0x18] sm:$0xff] %v446_v22  ;;  %457 = vadd.xlane.f32.xlu2 %v446_v22 }
 0x286   : > { %v452_v23 = vpop.xlane.xlu1 %451 }
 0x287   : > { %459 = vst.msk [vmem:[%s210_s24] sm:$0xff] %vm280_vm0, %v452_v23 }
 0x28e   : > { %v456_v24 = vpop.xlane.xlu0 %455  ;;  %v454_v25 = vpop.xlane.xlu2 %453 }
 0x28f   : > { %461 = vst.msk [vmem:[%s210_s24 + $0x10] sm:$0xff] %vm280_vm0, %v456_v24 }
 0x290   : > { %460 = vst.msk [vmem:[%s210_s24 + $0x8] sm:$0xff] %vm280_vm0, %v454_v25 }
 0x296   : > { %v458_v26 = vpop.xlane.xlu2 %457 }
 0x297   : > { %462 = vst.msk [vmem:[%s210_s24 + $0x18] sm:$0xff] %vm280_vm0, %v458_v26 }
 0x298 PF: > { %s15_s15 = sadd.s32 1, %s656_s15  }
 0x299   : > { %p12_p4 = scmp.ge.s32.totalorder %s15_s15, 4  }
 0x29b   :  { %14 = sbr.rel (!%p12_p4) target bundleno = 1 (0x1), region = 76 }

// kernel: res_tdnn_se_pallas.4
= control target key start
LH: loop header
LB: loop body
LE: loop exit
PB: predicated region body
PF: predicated region fallthrough
CT: control target
= control target key end

     0   :  { %s646_s18 = smov 0   ;;  %s738_s0 = inlined_call_operand.vmem [shape: f32[2,16,128], index: 0, kind: input, shape index: {}]   ;;  %s739_s1 = inlined_call_operand.vmem [shape: bf16[64,16], index: 1, kind: input, shape index: {}]   ;;  %s740_s2 = inlined_call_operand.vmem [shape: f32[32,1], index: 2, kind: input, shape index: {}]   ;;  %s741_s3 = inlined_call_operand.vmem [shape: f32[2,32,128], index: 3, kind: output, shape index: {0}]   ;;  %s742_s4 = inlined_call_operand.vmem [shape: f32[2,32,128], index: 4, kind: output, shape index: {1}]   ;;  %s743_s5 = inlined_call_operand.vmem [shape: f32[2,128,1], index: 5, kind: output, shape index: {2}]  }
   0x1 LB: > { %s550_s19 = sadd.s32 4294967295, %s613_s18   ;;  %p554_p0 = scmp.ge.s32.totalorder %s613_s18, 1  ;;  %s613_s18 = sphi %s646_s18, %s16_s18  }
   0x2   : > { %p192_p1 = scmp.lt.s32.totalorder %s613_s18, 3 }
   0x4   : > { %p193_p2 = pnand %p554_p0, %p192_p1 }
   0x5   : > { %p230_p3 = scmp.lt.s32.totalorder (!%p193_p2), %s550_s19, 1 }
   0x6   : > { %196 = sbr.rel (%p193_p2) target bundleno = 340 (0x154), region = 32 }
   0xb   : > { %v615_v0 = vmov 0   ;;  %v324_v1 = vld [vmem:[%s740_s2] sm:$0xff]  ;;  %v326_v2 = vld [vmem:[%s740_s2 + $0x10] sm:$0xff]  ;;  %s745_s19 = smov (!%p230_p3, %s550_s19), 1  ;;  %v590_v7 = vld [vmem:[%s739_s1 + $0x8] sm:$0xff]  ;;  %vm282_vm0 = vcmask 130048  }
   0xc   : > { %605 = vset.pattern.permute.xlu0 %v615_v0  ;;  %606 = vset.pattern.permute.xlu1 %v615_v0  ;;  %s585_s24 = sshll.u32 %s745_s19, 4  ;;  %v589_v6 = vld [vmem:[%s739_s1] sm:$0xff]  ;;  %v325_v8 = vld [vmem:[%s740_s2 + $0x8] sm:$0xff]  ;;  %v327_v9 = vld [vmem:[%s740_s2 + $0x18] sm:$0xff]  ;;  %s586_s15 = sshll.u32 %s745_s19, 5  ;;  %vm412_vm5 = vcmask 7168  }
   0xd   : > { %330 = vperm.xlu0 %605, %v324_v1   ;;  %340 = vperm.xlu1 %606, %v326_v2   ;;  %s234_s27 = scalar_lea.vmem %s738_s0, %s585_s24  ;;  %v591_v10 = vld [vmem:[%s739_s1 + $0x10] sm:$0xff]  ;;  %v592_v11 = vld [vmem:[%s739_s1 + $0x18] sm:$0xff]  ;;  %s239_s20 = scalar_lea.vmem %s741_s3, %s586_s15 }
   0xe   : > { %v251_v3 = vld [vmem:[%s234_s27] sm:$0xff]  ;;  %v252_v4 = vld [vmem:[%s234_s27 + $0x8] sm:$0xff]  ;;  %s691_s23 = scalar_lea.vmem %s742_s4, %s586_s15  ;;  %s588_s24 = sshll.u32 %s745_s19, 7 }
   0xf   : > { %v253_v5 = vpack.c.bf16 %v252_v4, %v251_v3  ;;  %s701_s27 = scalar_lea.vmem %s743_s5, %s588_s24 }
  0x11   : > { %302 = vmatpush.bf16.msra.mxu0 %v253_v5  ;;  %593 = vmatpush.bf16.msra.mxu1 %v253_v5 }
  0x12   : > { %594 = vmatpush.bf16.msra.mxu2 %v253_v5  ;;  %595 = vmatpush.bf16.msra.mxu3 %v253_v5 }
  0x14   : > { %579 = vmatmul.msk.bf16.vlgmr.msra.gmra.mxu0 %vm282_vm0, %v589_v6  ;;  %580 = vmatmul.msk.bf16.vlgmr.msra.gmra.mxu1 %vm282_vm0, %v590_v7 }
  0x15   : > { %335 = vperm.xlu0 %605, %v325_v8   ;;  %345 = vperm.xlu1 %606, %v327_v9  }
  0x16   : > { %581 = vmatmul.msk.bf16.vlgmr.msra.gmra.mxu2 %vm282_vm0, %v591_v10  ;;  %582 = vmatmul.msk.bf16.vlgmr.msra.gmra.mxu3 %vm282_vm0, %v592_v11 }
  0x7f   : > { %v331_v12 = vpop.permute.xlu0 %330  ;;  %v341_v13 = vpop.permute.xlu1 %340 }
  0x87   : > { %v336_v22 = vpop.permute.xlu0 %335  ;;  %v346_v23 = vpop.permute.xlu1 %345 }
  0x91   : > { %v304_v14 = vpop.f32.mrf.mxu0  ;;  %v309_v15 = vpop.f32.mrf.mxu1 }
  0x92   : > { %v348_v16 = vadd.f32 %v331_v12, %v304_v14  ;;  %v350_v17 = vadd.f32 %v341_v13, %v309_v15 }
  0x94   : > { %v356_v18 = vmul.f32 0.01, %v348_v16  ;;  %v358_v19 = vmul.f32 0.01, %v350_v17  ;;  %vm354_vm1 = vcmp.ge.f32.partialorder %v350_v17, 0.0  ;;  %vm352_vm2 = vcmp.ge.f32.partialorder %v348_v16, 0.0 }
  0x96   : > { %v362_v20 = vsel %vm354_vm1, %v350_v17, %v358_v19  ;;  %v360_v21 = vsel %vm352_vm2, %v348_v16, %v356_v18 }
  0x97   : > { %384 = vadd.xlane.f32.xlu0 %v362_v20  ;;  %366 = vst [vmem:[%s239_s20 + $0x10] sm:$0xff] %v362_v20  ;;  %380 = vadd.xlane.f32.xlu2 %v360_v21  ;;  %v368_v36 = vmul.f32 %v360_v21, %v360_v21  ;;  %v370_v38 = vmul.f32 %v362_v20, %v362_v20 }
  0x98   : > { %364 = vst [vmem:[%s239_s20] sm:$0xff] %v360_v21 }
  0x99   : > { %v314_v24 = vpop.f32.mrf.mxu2  ;;  %v319_v25 = vpop.f32.mrf.mxu3 }
  0x9a   : > { %372 = vst [vmem:[%s691_s23] sm:$0xff] %v314_v24  ;;  %v306_v26 = vpop.f32.mrf.mxu0  ;;  %v311_v27 = vpop.f32.mrf.mxu1  ;;  %v378_v39 = vmul.f32 %v319_v25, %v319_v25  ;;  %v376_v40 = vmul.f32 %v314_v24, %v314_v24 }
  0x9b   : > { %v349_v28 = vadd.f32 %v336_v22, %v306_v26  ;;  %374 = vst [vmem:[%s691_s23 + $0x10] sm:$0xff] %v319_v25  ;;  %v351_v29 = vadd.f32 %v346_v23, %v311_v27 }
  0x9d   : > { %v357_v30 = vmul.f32 0.01, %v349_v28  ;;  %v359_v31 = vmul.f32 0.01, %v351_v29  ;;  %vm355_vm3 = vcmp.ge.f32.partialorder %v351_v29, 0.0  ;;  %vm353_vm4 = vcmp.ge.f32.partialorder %v349_v28, 0.0 }
  0x9f   : > { %v363_v32 = vsel %vm355_vm3, %v351_v29, %v359_v31  ;;  %v361_v33 = vsel %vm353_vm4, %v349_v28, %v357_v30  ;;  %400 = vadd.xlane.f32.xlu0 %v319_v25  ;;  %396 = vadd.xlane.f32.xlu2 %v314_v24 }
  0xa0   : > { %367 = vst [vmem:[%s239_s20 + $0x18] sm:$0xff] %v363_v32  ;;  %386 = vadd.xlane.f32.xlu1 %v363_v32  ;;  %v369_v41 = vmul.f32 %v361_v33, %v361_v33  ;;  %v371_v42 = vmul.f32 %v363_v32, %v363_v32 }
  0xa1   : > { %v316_v34 = vpop.f32.mrf.mxu2  ;;  %365 = vst [vmem:[%s239_s20 + $0x8] sm:$0xff] %v361_v33  ;;  %v321_v37 = vpop.f32.mrf.mxu3 }
  0xa2   : > { %373 = vst [vmem:[%s691_s23 + $0x8] sm:$0xff] %v316_v34  ;;  %v377_v35 = vmul.f32 %v316_v34, %v316_v34  ;;  %v379_v43 = vmul.f32 %v321_v37, %v321_v37 }
  0xa3   : > { %375 = vst [vmem:[%s691_s23 + $0x18] sm:$0xff] %v321_v37 }
  0xa7   : > { %406 = vadd.xlane.f32.xlu0 %v377_v35  ;;  %388 = vadd.xlane.f32.xlu2 %v368_v36 }
  0xa8   : > { %402 = vadd.xlane.f32.xlu1 %v321_v37 }
  0xaf   : > { %392 = vadd.xlane.f32.xlu2 %v370_v38 }
  0xb0   : > { %408 = vadd.xlane.f32.xlu1 %v378_v39 }
  0xb7   : > { %404 = vadd.xlane.f32.xlu2 %v376_v40 }
  0xbf   : > { %382 = vadd.xlane.f32.xlu2 %v361_v33 }
  0xc7   : > { %398 = vadd.xlane.f32.xlu2 %v316_v34 }
  0xcf   : > { %390 = vadd.xlane.f32.xlu2 %v369_v41 }
  0xd7   : > { %394 = vadd.xlane.f32.xlu2 %v371_v42 }
  0xdf   : > { %410 = vadd.xlane.f32.xlu2 %v379_v43 }
 0x10a   : > { %v385_v44 = vpop.xlane.xlu0 %384  ;;  %v381_v45 = vpop.xlane.xlu2 %380 }
 0x10b   : > { %415 = vst.msk [vmem:[%s701_s27 + $0x10] sm:$0xff] %vm412_vm5, %v385_v44 }
 0x10c   : > { %413 = vst.msk [vmem:[%s701_s27] sm:$0xff] %vm412_vm5, %v381_v45 }
 0x112   : > { %v401_v46 = vpop.xlane.xlu0 %400  ;;  %v397_v47 = vpop.xlane.xlu2 %396 }
 0x113   : > { %423 = vst.msk [vmem:[%s701_s27 + $0x50] sm:$0xff] %vm412_vm5, %v401_v46  ;;  %v387_v48 = vpop.xlane.xlu1 %386 }
 0x114   : > { %421 = vst.msk [vmem:[%s701_s27 + $0x40] sm:$0xff] %vm412_vm5, %v397_v47 }
 0x115   : > { %416 = vst.msk [vmem:[%s701_s27 + $0x18] sm:$0xff] %vm412_vm5, %v387_v48 }
 0x11a   : > { %v407_v49 = vpop.xlane.xlu0 %406  ;;  %v389_v50 = vpop.xlane.xlu2 %388 }
 0x11b   : > { %426 = vst.msk [vmem:[%s701_s27 + $0x68] sm:$0xff] %vm412_vm5, %v407_v49  ;;  %v403_v51 = vpop.xlane.xlu1 %402 }
 0x11c   : > { %417 = vst.msk [vmem:[%s701_s27 + $0x20] sm:$0xff] %vm412_vm5, %v389_v50 }
 0x11d   : > { %424 = vst.msk [vmem:[%s701_s27 + $0x58] sm:$0xff] %vm412_vm5, %v403_v51 }
 0x122   : > { %v393_v52 = vpop.xlane.xlu2 %392 }
 0x123   : > { %419 = vst.msk [vmem:[%s701_s27 + $0x30] sm:$0xff] %vm412_vm5, %v393_v52  ;;  %v409_v53 = vpop.xlane.xlu1 %408 }
 0x124   : > { %427 = vst.msk [vmem:[%s701_s27 + $0x70] sm:$0xff] %vm412_vm5, %v409_v53 }
 0x12a   : > { %v405_v54 = vpop.xlane.xlu2 %404 }
 0x12b   : > { %425 = vst.msk [vmem:[%s701_s27 + $0x60] sm:$0xff] %vm412_vm5, %v405_v54 }
 0x132   : > { %v383_v55 = vpop.xlane.xlu2 %382 }
 0x133   : > { %414 = vst.msk [vmem:[%s701_s27 + $0x8] sm:$0xff] %vm412_vm5, %v383_v55 }
 0x13a   : > { %v399_v56 = vpop.xlane.xlu2 %398 }
 0x13b   : > { %422 = vst.msk [vmem:[%s701_s27 + $0x48] sm:$0xff] %vm412_vm5, %v399_v56 }
 0x142   : > { %v391_v57 = vpop.xlane.xlu2 %390 }
 0x143   : > { %418 = vst.msk [vmem:[%s701_s27 + $0x28] sm:$0xff] %vm412_vm5, %v391_v57 }
 0x14a   : > { %v395_v58 = vpop.xlane.xlu2 %394 }
 0x14b   : > { %420 = vst.msk [vmem:[%s701_s27 + $0x38] sm:$0xff] %vm412_vm5, %v395_v58 }
 0x152   : > { %v411_v59 = vpop.xlane.xlu2 %410 }
 0x153   : > { %428 = vst.msk [vmem:[%s701_s27 + $0x78] sm:$0xff] %vm412_vm5, %v411_v59 }
 0x154 PF: > { %s16_s18 = sadd.s32 1, %s613_s18  }
 0x155   : > { %p13_p4 = scmp.ge.s32.totalorder %s16_s18, 4  }
 0x157   :  { %15 = sbr.rel (!%p13_p4) target bundleno = 1 (0x1), region = 86 }

// kernel: res_tdnn_se_pallas.6
= control target key start
LH: loop header
LB: loop body
LE: loop exit
PB: predicated region body
PF: predicated region fallthrough
CT: control target
= control target key end

     0   :  { %s602_s18 = smov 0   ;;  %s676_s0 = inlined_call_operand.vmem [shape: f32[2,32,128], index: 0, kind: input, shape index: {}]   ;;  %s677_s1 = inlined_call_operand.vmem [shape: f32[2,32,1], index: 1, kind: input, shape index: {}]   ;;  %s678_s2 = inlined_call_operand.vmem [shape: f32[2,32,128], index: 2, kind: input, shape index: {}]   ;;  %s679_s3 = inlined_call_operand.vmem [shape: f32[32,2], index: 3, kind: input, shape index: {}]   ;;  %s680_s4 = inlined_call_operand.vmem [shape: f32[2,32,128], index: 4, kind: output, shape index: {0}]   ;;  %s681_s5 = inlined_call_operand.vmem [shape: f32[2,64,1], index: 5, kind: output, shape index: {1}]  }
   0x1 LB: > { %s523_s19 = sadd.s32 4294967295, %s568_s18   ;;  %p527_p0 = scmp.ge.s32.totalorder %s568_s18, 1  ;;  %s568_s18 = sphi %s602_s18, %s16_s18  }
   0x2   : > { %p210_p1 = scmp.lt.s32.totalorder %s568_s18, 3 }
   0x4   : > { %p211_p2 = pnand %p527_p0, %p210_p1 }
   0x5   : > { %p253_p3 = scmp.lt.s32.totalorder (!%p211_p2), %s523_s19, 1 }
   0x6   : > { %214 = sbr.rel (%p211_p2) target bundleno = 303 (0x12f), region = 36 }
   0xb   : > { %v284_v0 = vld [vmem:[%s679_s3 + $0x10] sm:$0xff]  ;;  %v282_v1 = vld [vmem:[%s679_s3] sm:$0xff]  ;;  %v570_v2 = vmov 1   ;;  %v571_v3 = vmov 0   ;;  %v285_v4 = vld [vmem:[%s679_s3 + $0x18] sm:$0xff]  ;;  %s683_s19 = smov (!%p253_p3, %s523_s19), 1 }
   0xc   : > { %557 = vset.pattern.permute.xlu0 %v570_v2  ;;  %555 = vset.pattern.permute.xlu1 %v571_v3  ;;  %v283_v5 = vld [vmem:[%s679_s3 + $0x8] sm:$0xff]  ;;  %s625_s28 = sshll.u32 %s683_s19, 5  ;;  %s544_s16 = sshll.u32 %s683_s19, 6  ;;  %vm402_vm4 = vcmask 7168  }
   0xd   : > { %556 = vset.pattern.permute.xlu2 %v570_v2  ;;  %319 = vperm.xlu0 %557, %v284_v0   ;;  %s262_s6 = scalar_lea.vmem %s677_s1, %s625_s28  ;;  %s635_s9 = scalar_lea.vmem %s678_s2, %s625_s28 }
   0xe   : > { %298 = vperm.xlu1 %555, %v284_v0   ;;  %311 = vperm.xlu2 %556, %v282_v1   ;;  %v334_v6 = vld [vmem:[%s262_s6] sm:$0xff]  ;;  %v337_v7 = vld [vmem:[%s262_s6 + $0x18] sm:$0xff]  ;;  %v335_v8 = vld [vmem:[%s262_s6 + $0x8] sm:$0xff]  ;;  %s641_s12 = scalar_lea.vmem %s676_s0, %s625_s28  ;;  %s651_s15 = scalar_lea.vmem %s680_s4, %s625_s28 }
   0xf   : > { %v336_v9 = vld [vmem:[%s262_s6 + $0x10] sm:$0xff]  ;;  %v330_v22 = vld [vmem:[%s641_s12] sm:$0xff]  ;;  %v281_v36 = vld [vmem:[%s635_s9 + $0x18] sm:$0xff]  ;;  %s277_s21 = scalar_lea.vmem %s681_s5, %s544_s16 }
  0x10   : > { %v280_v13 = vld [vmem:[%s635_s9 + $0x10] sm:$0xff]  ;;  %v278_v23 = vld [vmem:[%s635_s9] sm:$0xff]  ;;  %v279_v37 = vld [vmem:[%s635_s9 + $0x8] sm:$0xff] }
  0x11   : > { %v332_v16 = vld [vmem:[%s641_s12 + $0x10] sm:$0xff]  ;;  %v333_v38 = vld [vmem:[%s641_s12 + $0x18] sm:$0xff]  ;;  %v331_v42 = vld [vmem:[%s641_s12 + $0x8] sm:$0xff] }
  0x15   : > { %558 = vset.pattern.permute.xlu0 %v571_v3 }
  0x16   : > { %303 = vperm.xlu1 %555, %v285_v4   ;;  %288 = vperm.xlu0 %558, %v282_v1  }
  0x17   : > { %315 = vperm.xlu2 %556, %v283_v5  }
  0x1e   : > { %559 = vset.pattern.permute.xlu1 %v570_v2  ;;  %293 = vperm.xlu0 %558, %v283_v5  }
  0x1f   : > { %323 = vperm.xlu1 %559, %v285_v4   ;;  %560 = vset.pattern.permute.xlu2 %v571_v3 }
  0x20   : > { %340 = vperm.xlu2 %560, %v334_v6  }
  0x26   : > { %355 = vperm.xlu0 %558, %v337_v7  }
  0x27   : > { %561 = vset.pattern.permute.xlu1 %v571_v3 }
  0x28   : > { %345 = vperm.xlu1 %561, %v335_v8   ;;  %350 = vperm.xlu2 %560, %v336_v9  }
  0x68   : > { %v312_v10 = vpop.permute.xlu2 %311 }
  0x71   : > { %v316_v11 = vpop.permute.xlu2 %315 }
  0x7a   : > { %v341_v12 = vpop.permute.xlu2 %340 }
  0x7b   : > { %v358_v27 = vmul.f32 %v341_v12, %v330_v22 }
  0x7f   : > { %v320_v14 = vpop.permute.xlu0 %319 }
  0x80   : > { %v299_v15 = vpop.permute.xlu1 %298 }
  0x81   : > { %v308_v17 = vmul.f32 %v299_v15, %v280_v13 }
  0x82   : > { %v351_v18 = vpop.permute.xlu2 %350 }
  0x83   : > { %v328_v19 = vadd.f32 %v320_v14, %v308_v17  ;;  %v360_v20 = vmul.f32 %v351_v18, %v332_v16 }
  0x85   : > { %v364_v21 = vadd.f32 %v360_v20, %v328_v19 }
  0x87   : > { %vm368_vm0 = vcmp.ge.f32.partialorder %v364_v21, 0.0  ;;  %v372_v24 = vmul.f32 0.01, %v364_v21 }
  0x88   : > { %v304_v25 = vpop.permute.xlu1 %303  ;;  %v289_v26 = vpop.permute.xlu0 %288 }
  0x89   : > { %v306_v28 = vmul.f32 %v289_v26, %v278_v23  ;;  %v376_v29 = vsel %vm368_vm0, %v364_v21, %v372_v24  ;;  %v309_v39 = vmul.f32 %v304_v25, %v281_v36 }
  0x8a   : > { %390 = vadd.xlane.f32.xlu0 %v376_v29  ;;  %380 = vst [vmem:[%s651_s15 + $0x10] sm:$0xff] %v376_v29  ;;  %v384_v54 = vmul.f32 %v376_v29, %v376_v29 }
  0x8b   : > { %v326_v30 = vadd.f32 %v312_v10, %v306_v28 }
  0x8d   : > { %v362_v31 = vadd.f32 %v358_v27, %v326_v30 }
  0x8f   : > { %vm366_vm1 = vcmp.ge.f32.partialorder %v362_v31, 0.0  ;;  %v370_v32 = vmul.f32 0.01, %v362_v31 }
  0x90   : > { %v294_v33 = vpop.permute.xlu0 %293 }
  0x91   : > { %v324_v34 = vpop.permute.xlu1 %323  ;;  %v374_v35 = vsel %vm366_vm1, %v362_v31, %v370_v32  ;;  %v307_v40 = vmul.f32 %v294_v33, %v279_v37 }
  0x92   : > { %386 = vadd.xlane.f32.xlu1 %v374_v35  ;;  %378 = vst [vmem:[%s651_s15] sm:$0xff] %v374_v35  ;;  %v382_v43 = vmul.f32 %v374_v35, %v374_v35  ;;  %v329_v44 = vadd.f32 %v324_v34, %v309_v39 }
  0x93   : > { %v327_v47 = vadd.f32 %v316_v11, %v307_v40 }
  0x98   : > { %v356_v41 = vpop.permute.xlu0 %355 }
  0x99   : > { %v361_v45 = vmul.f32 %v356_v41, %v333_v38 }
  0x9a   : > { %v346_v46 = vpop.permute.xlu1 %345  ;;  %394 = vadd.xlane.f32.xlu1 %v382_v43 }
  0x9b   : > { %v365_v48 = vadd.f32 %v361_v45, %v329_v44  ;;  %v359_v49 = vmul.f32 %v346_v46, %v331_v42 }
  0x9d   : > { %v363_v50 = vadd.f32 %v359_v49, %v327_v47  ;;  %vm369_vm2 = vcmp.ge.f32.partialorder %v365_v48, 0.0  ;;  %v373_v51 = vmul.f32 0.01, %v365_v48 }
  0x9f   : > { %vm367_vm3 = vcmp.ge.f32.partialorder %v363_v50, 0.0  ;;  %v371_v52 = vmul.f32 0.01, %v363_v50  ;;  %v377_v53 = vsel %vm369_vm2, %v365_v48, %v373_v51 }
  0xa0   : > { %381 = vst [vmem:[%s651_s15 + $0x18] sm:$0xff] %v377_v53  ;;  %v385_v57 = vmul.f32 %v377_v53, %v377_v53 }
  0xa1   : > { %v375_v55 = vsel %vm367_vm3, %v363_v50, %v371_v52 }
  0xa2   : > { %388 = vadd.xlane.f32.xlu2 %v375_v55  ;;  %379 = vst [vmem:[%s651_s15 + $0x8] sm:$0xff] %v375_v55  ;;  %398 = vadd.xlane.f32.xlu1 %v384_v54  ;;  %v383_v56 = vmul.f32 %v375_v55, %v375_v55 }
  0xaa   : > { %392 = vadd.xlane.f32.xlu2 %v377_v53 }
  0xb2   : > { %396 = vadd.xlane.f32.xlu2 %v383_v56 }
  0xba   : > { %400 = vadd.xlane.f32.xlu2 %v385_v57 }
  0xfd   : > { %v391_v58 = vpop.xlane.xlu0 %390 }
  0xfe   : > { %405 = vst.msk [vmem:[%s277_s21 + $0x10] sm:$0xff] %vm402_vm4, %v391_v58 }
 0x105   : > { %v387_v59 = vpop.xlane.xlu1 %386 }
 0x106   : > { %403 = vst.msk [vmem:[%s277_s21] sm:$0xff] %vm402_vm4, %v387_v59 }
 0x10d   : > { %v395_v60 = vpop.xlane.xlu1 %394 }
 0x10e   : > { %407 = vst.msk [vmem:[%s277_s21 + $0x20] sm:$0xff] %vm402_vm4, %v395_v60 }
 0x115   : > { %v389_v61 = vpop.xlane.xlu2 %388  ;;  %v399_v62 = vpop.xlane.xlu1 %398 }
 0x116   : > { %404 = vst.msk [vmem:[%s277_s21 + $0x8] sm:$0xff] %vm402_vm4, %v389_v61 }
 0x117   : > { %409 = vst.msk [vmem:[%s277_s21 + $0x30] sm:$0xff] %vm402_vm4, %v399_v62 }
 0x11d   : > { %v393_v63 = vpop.xlane.xlu2 %392 }
 0x11e   : > { %406 = vst.msk [vmem:[%s277_s21 + $0x18] sm:$0xff] %vm402_vm4, %v393_v63 }
 0x125   : > { %v397_v0 = vpop.xlane.xlu2 %396 }
 0x126   : > { %408 = vst.msk [vmem:[%s277_s21 + $0x28] sm:$0xff] %vm402_vm4, %v397_v0 }
 0x12d   : > { %v401_v1 = vpop.xlane.xlu2 %400 }
 0x12e   : > { %410 = vst.msk [vmem:[%s277_s21 + $0x38] sm:$0xff] %vm402_vm4, %v401_v1 }
 0x12f PF: > { %s16_s18 = sadd.s32 1, %s568_s18  }
 0x130   : > { %p13_p4 = scmp.ge.s32.totalorder %s16_s18, 4  }
 0x132   :  { %15 = sbr.rel (!%p13_p4) target bundleno = 1 (0x1), region = 84 }

// kernel: res_tdnn_se_pallas.7
= control target key start
LH: loop header
LB: loop body
LE: loop exit
PB: predicated region body
PF: predicated region fallthrough
CT: control target
= control target key end

     0   :  { %7 = vsyncpa [#allocation3], 0  ;;  %s522_s0 = inlined_call_operand.vmem [shape: f32[2,32,128], index: 0, kind: input, shape index: {}]   ;;  %s523_s1 = inlined_call_operand.vmem [shape: f32[32,2], index: 1, kind: input, shape index: {}]   ;;  %s524_s2 = inlined_call_operand.hbm [shape: f32[2,32,128], index: 2, kind: output, shape index: {}]  }
   0x1   :  { %9 = vsyncpa [#allocation3 + $0x1], 0  ;;  %s421_s9 = smov 0   ;;  %s423_s10 = smov 0  }
   0x2   :  { %s425_s11 = smov 0   ;;  %s427_s12 = smov 0  }
   0x3 LB: > { %s442_s13 = sadd.s32 4294967295, %s400_s12   ;;  %s276_s14 = sadd.s32 4294967294, %s400_s12   ;;  %s400_s12 = sphi %s427_s12, %s530_s12   ;;  %s396_s11 = sphi %s425_s11, %s529_s11   ;;  %s392_s10 = sphi %s423_s10, %s528_s10   ;;  %s388_s9 = sphi %s421_s9, %s527_s9  }
   0x4   : > { %s446_s15 = sadd.s32 1, %s400_s12   ;;  %s69_s16 = sadd.s32 1, %s396_s11 }
   0x5   : > { %s66_s17 = ssub.s32 %s400_s12, %s446_s15  ;;  %p79_p0 = scmp.ne.s32.totalorder %s396_s11, %s392_s10 }
   0x6   : > { %p67_p1 = scmp.eq.s32.totalorder %s66_s17, 0  ;;  %p80_p2 = scmp.eq.s32.totalorder %s442_s13, 1 }
   0x7   : > { %p85_p3 = scmp.ne.s32.totalorder %s392_s10, %s388_s9  ;;  %p86_p4 = scmp.eq.s32.totalorder %s276_s14, 1 }
   0x8   : > { %s457_s18 = scalar_select %p67_p1, %s396_s11, %s69_s16  }
   0x9   : > { %p459_p5 = por %p80_p2, %p79_p0  ;;  %p463_p6 = por %p86_p4, %p85_p3 }
   0xa   : > { %p279_p7 = scmp.ge.s32.totalorder %s400_s12, 1  ;;  %p115_p8 = scmp.lt.s32.totalorder %s400_s12, 3 }
   0xc   : > { %p116_p9 = pnand %p279_p7, %p115_p8 }
   0xd   : > { %p137_p10 = scmp.lt.s32.totalorder (!%p116_p9), %s442_s13, 1  ;;  %s134_s6 = sand.u32 (!%p116_p9), 1, %s392_s10  }
   0xe   : > { %119 = sbr.rel (%p116_p9) target bundleno = 160 (0xa0), region = 28  ;;  %s280_s7 = sshll.u32 (!%p116_p9), %s134_s6, 5 }
   0xf   : > { %s136_s8 = scalar_lea.vmem (!%p116_p9), [#allocation2], %s280_s7  ;;  %s289_s14 = sshll.u32 (!%p116_p9), %s442_s13, 5 }
  0x10   : > { %s210_s21 = scalar_lea.hbm (!%p116_p9), %s524_s2, %s289_s14  ;;  %s211_s22 = sshll.u32 (!%p116_p9), %s136_s8, 4  ;;  %s212_s22 = int_to_ptr.vmem [resolvable:$true] %s211_s22 }
  0x11   : > { %s213_s23 = sshll.u32 (!%p116_p9), %s210_s21, 4  ;;  %s358_s28 = scalar_lea.hbm (!%p116_p9), %s524_s2, 64  ;;  %s214_s23 = int_to_ptr.hbm [resolvable:$true] %s213_s23 }
  0x12   : > { %s352_s24 = sshra.s32 (!%p116_p9), %s214_s23, 4  ;;  %s353_s24 = int_to_ptr.hbm [resolvable:$true] %s352_s24 }
  0x13   : > { %v148_v0 = vld [vmem:[%s523_s1 + $0x10] sm:$0xff]  ;;  %v146_v1 = vld [vmem:[%s523_s1] sm:$0xff]  ;;  %v402_v2 = vmov 0   ;;  %v403_v3 = vmov 1   ;;  %v149_v4 = vld [vmem:[%s523_s1 + $0x18] sm:$0xff]  ;;  %s138_s29 = scalar_select %p137_p10, %s442_s13, 1 }
  0x14   : > { %334 = vset.pattern.permute.xlu1 %v402_v2  ;;  %333 = vset.pattern.permute.xlu0 %v402_v2  ;;  %v147_v5 = vld [vmem:[%s523_s1 + $0x8] sm:$0xff]  ;;  %s199_s13 = scalar_lea.sflag [#allocation3], %s134_s6  ;;  %s354_s25 = scalar_lea.hbm %s353_s24, 32 }
  0x15   : > { %162 = vperm.xlu1 %334, %v148_v0   ;;  %152 = vperm.xlu0 %333, %v146_v1   ;;  %s288_s30 = sshll.u32 %s138_s29, 5  ;;  %p355_p11 = scmp.ne.s32.totalorder %s353_s24, %s354_s25 }
  0x16   : > { %335 = vset.pattern.permute.xlu2 %v403_v3  ;;  %s141_s5 = scalar_lea.vmem %s522_s0, %s288_s30  ;;  %p359_p0 = scmp.lt.s32.totalorder %s353_s24, %s524_s2 }
  0x17   : > { %175 = vperm.xlu2 %335, %v146_v1   ;;  %v142_v7 = vld [vmem:[%s141_s5] sm:$0xff]  ;;  %v143_v12 = vld [vmem:[%s141_s5 + $0x8] sm:$0xff]  ;;  %v144_v18 = vld [vmem:[%s141_s5 + $0x10] sm:$0xff]  ;;  %p356_p12 = pnand %p355_p11, %p459_p5  ;;  %p360_p1 = scmp.lt.s32.totalorder %s358_s28, %s354_s25 }
  0x18   : > { %v145_v19 = vld [vmem:[%s141_s5 + $0x18] sm:$0xff] }
  0x19   : > { %p357_p13 = pneg %p356_p12  ;;  %p361_p2 = por %p360_p1, %p359_p0 }
  0x1b   : > { %p362_p3 = pnand %p361_p2, %p357_p13 }
  0x1d   : > { %167 = vperm.xlu1 %334, %v149_v4   ;;  %157 = vperm.xlu0 %333, %v147_v5  }
  0x1f   : > { %179 = vperm.xlu2 %335, %v147_v5  }
  0x25   : > { %337 = vset.pattern.permute.xlu1 %v403_v3  ;;  %336 = vset.pattern.permute.xlu0 %v403_v3 }
  0x26   : > { %187 = vperm.xlu1 %337, %v149_v4   ;;  %183 = vperm.xlu0 %336, %v148_v0  }
  0x71   : > { %v176_v6 = vpop.permute.xlu2 %175 }
  0x79   : > { %v180_v13 = vpop.permute.xlu2 %179 }
  0x87   : > { %v163_v8 = vpop.permute.xlu1 %162  ;;  %v153_v9 = vpop.permute.xlu0 %152 }
  0x88   : > { %v170_v10 = vmul.f32 %v153_v9, %v142_v7  ;;  %v172_v20 = vmul.f32 %v163_v8, %v144_v18 }
  0x8a   : > { %v190_v11 = vadd.f32 %v176_v6, %v170_v10 }
  0x8c   : > { %194 = vst [vmem:[%s136_s8] sm:$0xff] %v190_v11 }
  0x8f   : > { %v168_v14 = vpop.permute.xlu1 %167  ;;  %v158_v15 = vpop.permute.xlu0 %157 }
  0x90   : > { %v171_v16 = vmul.f32 %v158_v15, %v143_v12  ;;  %v173_v21 = vmul.f32 %v168_v14, %v145_v19 }
  0x92   : > { %v191_v17 = vadd.f32 %v180_v13, %v171_v16 }
  0x94   : > { %195 = vst [vmem:[%s136_s8 + $0x8] sm:$0xff] %v191_v17 }
  0x98   : > { %v188_v22 = vpop.permute.xlu1 %187  ;;  %v184_v23 = vpop.permute.xlu0 %183 }
  0x99   : > { %v193_v24 = vadd.f32 %v188_v22, %v173_v21  ;;  %v192_v25 = vadd.f32 %v184_v23, %v172_v20 }
  0x9b   : > { %197 = vst [vmem:[%s136_s8 + $0x18] sm:$0xff] %v193_v24 }
  0x9c   : > { %196 = vst [vmem:[%s136_s8 + $0x10] sm:$0xff] %v192_v25 }
  0x9d   : > { %365 = shalt.err (!%p362_p3)
}
  0x9e   : > { %s404_s3 = smov 128   ;;  %s405_s4 = smov 8  }
  0x9f   : > { %290 = dma.vmem_to_hbm [thread:$0]  (%p459_p5), %s212_s22, 512, %s214_s23, %s199_s13, %s404_s3, %s404_s3, %s405_s4  }
  0xa0 PF: > { %p296_p4 = scmp.ge.s32.totalorder %s400_s12, 2  ;;  %s228_s5 = sand.u32 1, %s388_s9  }
  0xa1   : > { %s229_s6 = scalar_lea.sflag [#allocation3], %s228_s5 }
  0xa2   : > { %p293_p7 = pnand %p296_p4, %p463_p6 }
  0xa4   : > { %p294_p8 = pneg %p293_p7 }
  0xa6   : > { %383 = dma.done.wait (%p294_p8), %s229_s6, 512  }
  0xa7   : > { %385 = vsyncadd (%p294_p8), %s229_s6, 4294966784  ;;  %p12_p9 = scmp.ge.s32.totalorder %s446_s15, 4   ;;  %s527_s9 = smov %s392_s10 }
  0xa8   : > { %s528_s10 = smov %s396_s11  ;;  %s529_s11 = smov %s457_s18 }
  0xa9   : > { %s530_s12 = smov %s446_s15  ;;  %14 = sbr.rel (!%p12_p9) target bundleno = 3 (0x3), region = 63 }
  0xae   :  { %235 = vsyncpa [#allocation3], 1 }
  0xaf   :  { %237 = vsyncpa [#allocation3 + $0x1], 1 }

</bundles_post_ra>
